<compile_context>
chip_gen: v5e
topology: v5e:2x2
jax: 0.10.0
libtpu: 0.0.40
codegen_flags: <defaults>
</compile_context>

<pallas_src>
import jax
import jax.numpy as jnp
from jax.experimental import pallas as pl
from jax.experimental.pallas import tpu as pltpu


def _round_up(n, m):
    return ((n + m - 1) // m) * m


def autoencoder_kernel(x_ref,
                       w1_ref, b1_ref,   # encoder layer 1: (D,H) bf16, (1,H) f32
                       w2_ref, b2_ref,   # encoder layer 2: (H,C) bf16, (1,C) f32
                       w3_ref, b3_ref,   # decoder layer 1: (C,H) bf16, (1,H) f32
                       w4_ref, b4_ref,   # decoder layer 2: (H,D) bf16, (1,D) f32
                       code_ref, recon_ref):
    # x arrives unpadded in f32; cast per-tile to bf16 for the MXU.
    # NOTE: for the last partial batch block, out-of-range rows hold
    # unspecified VMEM contents; they flow through the matmuls but the
    # corresponding output rows are masked on store, so results are correct.
    # Do not add in-kernel reductions over the batch (row) axis.
    x = x_ref[...].astype(jnp.bfloat16)                       # (T, D)

    # ----- encoder -----
    h1 = jnp.dot(x, w1_ref[...],
                 preferred_element_type=jnp.float32) + b1_ref[...]
    h1 = jnp.maximum(h1, 0.0)                                 # ReLU in f32
    code = jnp.dot(h1.astype(jnp.bfloat16), w2_ref[...],
                   preferred_element_type=jnp.float32) + b2_ref[...]

    # ----- decoder -----
    h2 = jnp.dot(code.astype(jnp.bfloat16), w3_ref[...],
                 preferred_element_type=jnp.float32) + b3_ref[...]
    h2 = jnp.maximum(h2, 0.0)
    recon = jnp.dot(h2.astype(jnp.bfloat16), w4_ref[...],
                    preferred_element_type=jnp.float32) + b4_ref[...]

    code_ref[...] = code.astype(code_ref.dtype)               # (T, C) f32
    recon_ref[...] = recon.astype(recon_ref.dtype)            # (T, D) f32


def autoencoder_forward(x, params, *, batch_tile=1024):
    """x: (B, D) float32. params: transposed weights (in, out), biases (1, out).

    Returns (code (B, C), recon (B, D)) in float32, matching the PyTorch module.
    """
    B, D = x.shape
    H = params["w1"].shape[1]
    C = params["w2"].shape[1]

    # Batch tile: big enough to amortize per-grid-step overhead, but capped so
    # the grid has at least 2 steps whenever B allows it (so the batch axis can
    # split across v7x's two TensorCores).  Multiple of 8 (sublane) unless it
    # covers the full batch.
    tile = min(batch_tile, _round_up(max(-(-B // 2), 1), 8))
    tile = max(tile, 8)
    if tile >= B:
        tile = B                      # single full-batch block (full-dim exception)
    grid = (pl.cdiv(B, tile),)

    # Weights to bf16 once (tiny arrays); biases stay f32.
    w1 = params["w1"].astype(jnp.bfloat16)
    w2 = params["w2"].astype(jnp.bfloat16)
    w3 = params["w3"].astype(jnp.bfloat16)
    w4 = params["w4"].astype(jnp.bfloat16)
    b1, b2, b3, b4 = params["b1"], params["b2"], params["b3"], params["b4"]

    # Weights/biases: constant index_map -> DMA'd once, resident in VMEM.
    def const_spec(shape):
        return pl.BlockSpec(shape, lambda i: (0, 0))

    in_specs = [
        pl.BlockSpec((tile, D), lambda i: (i, 0)),   # x tile (unpadded, f32)
        const_spec((D, H)), const_spec((1, H)),
        const_spec((H, C)), const_spec((1, C)),
        const_spec((C, H)), const_spec((1, H)),
        const_spec((H, D)), const_spec((1, D)),
    ]
    out_specs = [
        pl.BlockSpec((tile, C), lambda i: (i, 0)),   # code, real width
        pl.BlockSpec((tile, D), lambda i: (i, 0)),   # recon, real width
    ]
    out_shape = [
        jax.ShapeDtypeStruct((B, C), jnp.float32),
        jax.ShapeDtypeStruct((B, D), jnp.float32),
    ]

    # Mem-bound cost hint for the XLA scheduler.
    flops = 2 * B * (D * H + H * C + C * H + H * D)
    bytes_accessed = (B * D * 4                     # x read (f32)
                      + B * C * 4 + B * D * 4       # code + recon writes (f32)
                      + 2 * (D * H + H * C + C * H + H * D)   # bf16 weights
                      + 4 * (2 * H + C + D))        # f32 biases
    cost = pl.CostEstimate(flops=flops, transcendentals=0,
                           bytes_accessed=bytes_accessed)

    code, recon = pl.pallas_call(
        autoencoder_kernel,
        grid=grid,
        in_specs=in_specs,
        out_specs=out_specs,
        out_shape=out_shape,
        compiler_params=pltpu.CompilerParams(
            dimension_semantics=("parallel",)),
        cost_estimate=cost,
    )(x, w1, b1, w2, b2, w3, b3, w4, b4)

    return code, recon


def init_params(key, input_dim, hidden_dim=64, code_dim=2):
    """Deterministic synthetic init. Weights stored transposed: (in, out)."""
    ks = jax.random.split(key, 8)

    def lin(kw, kb, fan_in, fan_out):
        # mimic PyTorch's uniform(-1/sqrt(fan_in), 1/sqrt(fan_in)) init
        bound = 1.0 / jnp.sqrt(fan_in)
        w = jax.random.uniform(kw, (fan_in, fan_out), jnp.float32, -bound, bound)
        b = jax.random.uniform(kb, (1, fan_out), jnp.float32, -bound, bound)
        return w, b

    w1, b1 = lin(ks[0], ks[1], input_dim, hidden_dim)
    w2, b2 = lin(ks[2], ks[3], hidden_dim, code_dim)
    w3, b3 = lin(ks[4], ks[5], code_dim, hidden_dim)
    w4, b4 = lin(ks[6], ks[7], hidden_dim, input_dim)
    return {"w1": w1, "b1": b1, "w2": w2, "b2": b2,
            "w3": w3, "b3": b3, "w4": w4, "b4": b4}


def reference_forward(x, p):
    h1 = jnp.maximum(x @ p["w1"] + p["b1"], 0.0)
    code = h1 @ p["w2"] + p["b2"]
    h2 = jnp.maximum(code @ p["w3"] + p["b3"], 0.0)
    recon = h2 @ p["w4"] + p["b4"]
    return code, recon


if __name__ == "__main__":
    key = jax.random.PRNGKey(0)
    k_x, k_p = jax.random.split(key)

    B, D = 64, 32            # small batch of standardized feature rows, input_dim=32
    HIDDEN, CODE = 64, 2

    x = jax.random.normal(k_x, (B, D), dtype=jnp.float32)
    params = init_params(k_p, D, HIDDEN, CODE)
    code_ref, recon_ref = reference_forward(x, params)

    # (1) default tiling: tile=32, grid=(2,) -> both TCs engaged on v7x.
    code, recon = autoencoder_forward(x, params)
    jax.block_until_ready((code, recon))
    assert code.shape == (B, CODE) and recon.shape == (B, D)
    assert jnp.allclose(code, code_ref, atol=3e-2, rtol=3e-2)
    assert jnp.allclose(recon, recon_ref, atol=3e-2, rtol=3e-2)

    # (2) small tile exercises a deeper (grid=(4,)) batch pipeline.
    code2, recon2 = autoencoder_forward(x, params, batch_tile=16)
    jax.block_until_ready((code2, recon2))
    assert jnp.allclose(code2, code_ref, atol=3e-2, rtol=3e-2)
    assert jnp.allclose(recon2, recon_ref, atol=3e-2, rtol=3e-2)

    print("KERNEL_OK")
</pallas_src>

<mosaic_0001>
module attributes {stable_mosaic.version = 11 : i64} {
  func.func @autoencoder_kernel(%arg0: i32, %arg1: memref<32x32xf32, #tpu.memory_space<vmem>>, %arg2: memref<32x64xbf16, #tpu.memory_space<vmem>>, %arg3: memref<1x64xf32, #tpu.memory_space<vmem>>, %arg4: memref<64x2xbf16, #tpu.memory_space<vmem>>, %arg5: memref<1x2xf32, #tpu.memory_space<vmem>>, %arg6: memref<2x64xbf16, #tpu.memory_space<vmem>>, %arg7: memref<1x64xf32, #tpu.memory_space<vmem>>, %arg8: memref<64x32xbf16, #tpu.memory_space<vmem>>, %arg9: memref<1x32xf32, #tpu.memory_space<vmem>>, %arg10: memref<32x2xf32, #tpu.memory_space<vmem>>, %arg11: memref<32x32xf32, #tpu.memory_space<vmem>>) attributes {dimension_semantics = [#tpu.dimension_semantics<parallel>], iteration_bounds = array<i64: 2>, scalar_prefetch = 0 : i64, scratch_operands = 0 : i64, tpu.core_type = #tpu.core_type<tc>, window_params = [{transform_indices = @transform_0, window_bounds = array<i64: 32, 32>}, {pipeline_mode = #tpu.pipeline_mode<synchronous>, transform_indices = @transform_1, window_bounds = array<i64: 32, 64>}, {pipeline_mode = #tpu.pipeline_mode<synchronous>, transform_indices = @transform_2, window_bounds = array<i64: 1, 64>}, {pipeline_mode = #tpu.pipeline_mode<synchronous>, transform_indices = @transform_3, window_bounds = array<i64: 64, 2>}, {pipeline_mode = #tpu.pipeline_mode<synchronous>, transform_indices = @transform_4, window_bounds = array<i64: 1, 2>}, {pipeline_mode = #tpu.pipeline_mode<synchronous>, transform_indices = @transform_5, window_bounds = array<i64: 2, 64>}, {pipeline_mode = #tpu.pipeline_mode<synchronous>, transform_indices = @transform_6, window_bounds = array<i64: 1, 64>}, {pipeline_mode = #tpu.pipeline_mode<synchronous>, transform_indices = @transform_7, window_bounds = array<i64: 64, 32>}, {pipeline_mode = #tpu.pipeline_mode<synchronous>, transform_indices = @transform_8, window_bounds = array<i64: 1, 32>}, {transform_indices = @transform_9, window_bounds = array<i64: 32, 2>}, {transform_indices = @transform_10, window_bounds = array<i64: 32, 32>}]} {
    %c0 = arith.constant 0 : index
    %c0_0 = arith.constant 0 : index
    %0 = vector.load %arg1[%c0, %c0_0] : memref<32x32xf32, #tpu.memory_space<vmem>>, vector<32x32xf32>
    %1 = arith.truncf %0 : vector<32x32xf32> to vector<32x32xbf16>
    %c0_1 = arith.constant 0 : index
    %c0_2 = arith.constant 0 : index
    %2 = vector.load %arg2[%c0_1, %c0_2] : memref<32x64xbf16, #tpu.memory_space<vmem>>, vector<32x64xbf16>
    %cst = arith.constant dense<0.000000e+00> : vector<32x64xf32>
    %3 = tpu.matmul %1, %2, %cst {dimension_numbers = #tpu.dot_dimension_numbers<[1], [0], [0], [1], [0, 0, 1, 1], [], []>} : vector<32x32xbf16>, vector<32x64xbf16>, vector<32x64xf32> -> vector<32x64xf32>
    %c0_3 = arith.constant 0 : index
    %c0_4 = arith.constant 0 : index
    %4 = vector.load %arg3[%c0_3, %c0_4] : memref<1x64xf32, #tpu.memory_space<vmem>>, vector<1x64xf32>
    %5 = vector.broadcast %4 : vector<1x64xf32> to vector<32x64xf32>
    %6 = arith.addf %3, %5 : vector<32x64xf32>
    %cst_5 = arith.constant 0.000000e+00 : f32
    %7 = vector.broadcast %cst_5 : f32 to vector<32x64xf32>
    %8 = arith.maximumf %6, %7 : vector<32x64xf32>
    %9 = arith.truncf %8 : vector<32x64xf32> to vector<32x64xbf16>
    %c0_6 = arith.constant 0 : index
    %c0_7 = arith.constant 0 : index
    %10 = vector.load %arg4[%c0_6, %c0_7] : memref<64x2xbf16, #tpu.memory_space<vmem>>, vector<64x2xbf16>
    %cst_8 = arith.constant dense<0.000000e+00> : vector<32x2xf32>
    %11 = tpu.matmul %9, %10, %cst_8 {dimension_numbers = #tpu.dot_dimension_numbers<[1], [0], [0], [1], [0, 0, 1, 1], [], []>} : vector<32x64xbf16>, vector<64x2xbf16>, vector<32x2xf32> -> vector<32x2xf32>
    %c0_9 = arith.constant 0 : index
    %c0_10 = arith.constant 0 : index
    %12 = vector.load %arg5[%c0_9, %c0_10] : memref<1x2xf32, #tpu.memory_space<vmem>>, vector<1x2xf32>
    %13 = vector.broadcast %12 : vector<1x2xf32> to vector<32x2xf32>
    %14 = arith.addf %11, %13 : vector<32x2xf32>
    %15 = arith.truncf %14 : vector<32x2xf32> to vector<32x2xbf16>
    %c0_11 = arith.constant 0 : index
    %c0_12 = arith.constant 0 : index
    %16 = vector.load %arg6[%c0_11, %c0_12] : memref<2x64xbf16, #tpu.memory_space<vmem>>, vector<2x64xbf16>
    %cst_13 = arith.constant dense<0.000000e+00> : vector<32x64xf32>
    %17 = tpu.matmul %15, %16, %cst_13 {dimension_numbers = #tpu.dot_dimension_numbers<[1], [0], [0], [1], [0, 0, 1, 1], [], []>} : vector<32x2xbf16>, vector<2x64xbf16>, vector<32x64xf32> -> vector<32x64xf32>
    %c0_14 = arith.constant 0 : index
    %c0_15 = arith.constant 0 : index
    %18 = vector.load %arg7[%c0_14, %c0_15] : memref<1x64xf32, #tpu.memory_space<vmem>>, vector<1x64xf32>
    %19 = vector.broadcast %18 : vector<1x64xf32> to vector<32x64xf32>
    %20 = arith.addf %17, %19 : vector<32x64xf32>
    %cst_16 = arith.constant 0.000000e+00 : f32
    %21 = vector.broadcast %cst_16 : f32 to vector<32x64xf32>
    %22 = arith.maximumf %20, %21 : vector<32x64xf32>
    %23 = arith.truncf %22 : vector<32x64xf32> to vector<32x64xbf16>
    %c0_17 = arith.constant 0 : index
    %c0_18 = arith.constant 0 : index
    %24 = vector.load %arg8[%c0_17, %c0_18] : memref<64x32xbf16, #tpu.memory_space<vmem>>, vector<64x32xbf16>
    %cst_19 = arith.constant dense<0.000000e+00> : vector<32x32xf32>
    %25 = tpu.matmul %23, %24, %cst_19 {dimension_numbers = #tpu.dot_dimension_numbers<[1], [0], [0], [1], [0, 0, 1, 1], [], []>} : vector<32x64xbf16>, vector<64x32xbf16>, vector<32x32xf32> -> vector<32x32xf32>
    %c0_20 = arith.constant 0 : index
    %c0_21 = arith.constant 0 : index
    %26 = vector.load %arg9[%c0_20, %c0_21] : memref<1x32xf32, #tpu.memory_space<vmem>>, vector<1x32xf32>
    %27 = vector.broadcast %26 : vector<1x32xf32> to vector<32x32xf32>
    %28 = arith.addf %25, %27 : vector<32x32xf32>
    %c0_22 = arith.constant 0 : index
    %c0_23 = arith.constant 0 : index
    %29 = vector.load %arg10[%c0_22, %c0_23] : memref<32x2xf32, #tpu.memory_space<vmem>>, vector<32x2xf32>
    tpu.vector_store %arg10[%c0_22, %c0_23], %14 {strides = array<i32>} : memref<32x2xf32, #tpu.memory_space<vmem>>, vector<32x2xf32>,
    %c0_24 = arith.constant 0 : index
    %c0_25 = arith.constant 0 : index
    %30 = vector.load %arg11[%c0_24, %c0_25] : memref<32x32xf32, #tpu.memory_space<vmem>>, vector<32x32xf32>
    tpu.vector_store %arg11[%c0_24, %c0_25], %28 {strides = array<i32>} : memref<32x32xf32, #tpu.memory_space<vmem>>, vector<32x32xf32>,
    return
  }
  func.func @transform_0(%arg0: i32) -> (i32, i32) {
    %c0_i32 = arith.constant 0 : i32
    %c0_i32_0 = arith.constant 0 : i32
    return %arg0, %c0_i32 : i32, i32
  }
  func.func @transform_1(%arg0: i32) -> (i32, i32) {
    %c0_i32 = arith.constant 0 : i32
    %c0_i32_0 = arith.constant 0 : i32
    %c0_i32_1 = arith.constant 0 : i32
    return %c0_i32, %c0_i32_0 : i32, i32
  }
  func.func @transform_2(%arg0: i32) -> (i32, i32) {
    %c0_i32 = arith.constant 0 : i32
    %c0_i32_0 = arith.constant 0 : i32
    %c0_i32_1 = arith.constant 0 : i32
    return %c0_i32, %c0_i32_0 : i32, i32
  }
  func.func @transform_3(%arg0: i32) -> (i32, i32) {
    %c0_i32 = arith.constant 0 : i32
    %c0_i32_0 = arith.constant 0 : i32
    %c0_i32_1 = arith.constant 0 : i32
    return %c0_i32, %c0_i32_0 : i32, i32
  }
  func.func @transform_4(%arg0: i32) -> (i32, i32) {
    %c0_i32 = arith.constant 0 : i32
    %c0_i32_0 = arith.constant 0 : i32
    %c0_i32_1 = arith.constant 0 : i32
    return %c0_i32, %c0_i32_0 : i32, i32
  }
  func.func @transform_5(%arg0: i32) -> (i32, i32) {
    %c0_i32 = arith.constant 0 : i32
    %c0_i32_0 = arith.constant 0 : i32
    %c0_i32_1 = arith.constant 0 : i32
    return %c0_i32, %c0_i32_0 : i32, i32
  }
  func.func @transform_6(%arg0: i32) -> (i32, i32) {
    %c0_i32 = arith.constant 0 : i32
    %c0_i32_0 = arith.constant 0 : i32
    %c0_i32_1 = arith.constant 0 : i32
    return %c0_i32, %c0_i32_0 : i32, i32
  }
  func.func @transform_7(%arg0: i32) -> (i32, i32) {
    %c0_i32 = arith.constant 0 : i32
    %c0_i32_0 = arith.constant 0 : i32
    %c0_i32_1 = arith.constant 0 : i32
    return %c0_i32, %c0_i32_0 : i32, i32
  }
  func.func @transform_8(%arg0: i32) -> (i32, i32) {
    %c0_i32 = arith.constant 0 : i32
    %c0_i32_0 = arith.constant 0 : i32
    %c0_i32_1 = arith.constant 0 : i32
    return %c0_i32, %c0_i32_0 : i32, i32
  }
  func.func @transform_9(%arg0: i32) -> (i32, i32) {
    %c0_i32 = arith.constant 0 : i32
    %c0_i32_0 = arith.constant 0 : i32
    return %arg0, %c0_i32 : i32, i32
  }
  func.func @transform_10(%arg0: i32) -> (i32, i32) {
    %c0_i32 = arith.constant 0 : i32
    %c0_i32_0 = arith.constant 0 : i32
    return %arg0, %c0_i32 : i32, i32
  }
}

</mosaic_0001>

<bundles_post_ra>
// kernel: tpu_custom_call.1
= control target key start
LH: loop header
LB: loop body
LE: loop exit
PB: predicated region body
PF: predicated region fallthrough
CT: control target
= control target key end

     0   :  { %s846_s13 = smov 0   ;;  %s926_s0 = inlined_call_operand.vmem [shape: f32[64,32], index: 0, kind: input, shape index: {}]   ;;  %s927_s1 = inlined_call_operand.vmem [shape: bf16[32,64], index: 1, kind: input, shape index: {}]   ;;  %s928_s2 = inlined_call_operand.vmem [shape: f32[1,64], index: 2, kind: input, shape index: {}]   ;;  %s929_s3 = inlined_call_operand.vmem [shape: bf16[64,2], index: 3, kind: input, shape index: {}]   ;;  %s930_s4 = inlined_call_operand.vmem [shape: f32[1,2], index: 4, kind: input, shape index: {}]   ;;  %s931_s5 = inlined_call_operand.vmem [shape: bf16[2,64], index: 5, kind: input, shape index: {}]   ;;  %s932_s6 = inlined_call_operand.vmem [shape: f32[1,64], index: 6, kind: input, shape index: {}]   ;;  %s933_s7 = inlined_call_operand.vmem [shape: bf16[64,32], index: 7, kind: input, shape index: {}]   ;;  %s934_s8 = inlined_call_operand.vmem [shape: f32[1,32], index: 8, kind: input, shape index: {}]   ;;  %s935_s9 = inlined_call_operand.vmem [shape: f32[64,2], index: 9, kind: output, shape index: {0}]   ;;  %s936_s10 = inlined_call_operand.vmem [shape: f32[64,32], index: 10, kind: output, shape index: {1}]  }
   0x1 LB: > { %s700_s14 = sadd.s32 4294967295, %s789_s13   ;;  %p704_p0 = scmp.ge.s32.totalorder %s789_s13, 1  ;;  %s789_s13 = sphi %s846_s13, %s21_s13  }
   0x2   : > { %p316_p1 = scmp.lt.s32.totalorder %s789_s13, 3 }
   0x4   : > { %p317_p2 = pnand %p704_p0, %p316_p1 }
   0x5   : > { %s705_s17 = sshll.u32 (!%p317_p2), %s700_s14, 2 }
   0x6   : > { %320 = sbr.rel (%p317_p2) target bundleno = 602 (0x25a), region = 56  ;;  %p360_p3 = scmp.lt.s32.totalorder (!%p317_p2), %s705_s17, 7 }
   0xb   : > { %v762_v0 = vld [vmem:[%s927_s1 + $0x8] sm:$0xff]  ;;  %v761_v1 = vld [vmem:[%s927_s1] sm:$0xff]  ;;  %s938_s17 = smov (!%p360_p3, %s705_s17), 7  ;;  %vm404_vm0 = vcmask 261120   ;;  %v766_v8 = vld [vmem:[%s929_s3 + $0x18] sm:$0xff]  ;;  %vm472_vm1 = vcmask 523264  }
   0xc   : > { %417 = vmatpush.bf16.msra.mxu0 %v762_v0  ;;  %s860_s20 = sshll.u32 %s938_s17, 3  ;;  %483 = vmatpush.bf16.msra.mxu1 %v766_v8  ;;  %v765_v9 = vld [vmem:[%s929_s3 + $0x10] sm:$0xff]  ;;  %v764_v10 = vld [vmem:[%s929_s3 + $0x8] sm:$0xff]  ;;  %v763_v11 = vld [vmem:[%s929_s3] sm:$0xff]  ;;  %vm512_vm2 = vcmask 1040384   ;;  %vm505_vm3 = vcmask 15360  }
   0xd   : > { %s363_s23 = scalar_lea.vmem %s926_s0, %s860_s20  ;;  %v779_v13 = vld [vmem:[%s928_s2] ss:$0 sm:$0xff]  ;;  %s369_s22 = scalar_lea.vmem %s935_s9, %s860_s20  ;;  %v770_v40 = vld [vmem:[%s933_s7 + $0x18] sm:$0xff]  ;;  %v769_v41 = vld [vmem:[%s933_s7 + $0x10] sm:$0xff] }
   0xe   : > { %v378_v2 = vld [vmem:[%s363_s23] sm:$0xff]  ;;  %v379_v3 = vld [vmem:[%s363_s23 + $0x8] sm:$0xff]  ;;  %v380_v5 = vld [vmem:[%s363_s23 + $0x10] sm:$0xff]  ;;  %587 = vmatpush.bf16.msra.mxu3 %v770_v40  ;;  %s375_s18 = scalar_lea.vmem %s936_s10, %s860_s20 }
   0xf   : > { %v382_v4 = vpack.c.bf16 %v379_v3, %v378_v2  ;;  %v381_v6 = vld [vmem:[%s363_s23 + $0x18] sm:$0xff]  ;;  %v500_v27 = vld [vmem:[%s931_s5] sm:$0x1]  ;;  %v768_v42 = vld [vmem:[%s933_s7 + $0x8] sm:$0xff] }
  0x10   : > { %418 = vmatpush.bf16.msra.mxu0 %v761_v1  ;;  %v383_v7 = vpack.c.bf16 %v381_v6, %v380_v5  ;;  %484 = vmatpush.bf16.msra.mxu1 %v765_v9  ;;  %v514_v28 = vsel %vm512_vm2, %v500_v27, 0  ;;  %v780_v29 = vld [vmem:[%s930_s4] ss:$0 sm:$0xff] }
  0x11   : > { %523 = vmatpush.bf16.msra.mxu2 %v514_v28  ;;  %v767_v43 = vld [vmem:[%s933_s7] sm:$0xff] }
  0x12   : > { %588 = vmatpush.bf16.msra.mxu3 %v769_v41  ;;  %v781_v45 = vld [vmem:[%s932_s6] ss:$0 sm:$0xff] }
  0x13   : > { %719 = vmatmul.msk.bf16.vlgmr.msra.gmra.mxu0 %vm404_vm0, %v382_v4  ;;  %v782_v59 = vld [vmem:[%s934_s8] ss:$0 sm:$0xff] }
  0x14   : > { %485 = vmatpush.bf16.msra.mxu1 %v764_v10 }
  0x16   : > { %589 = vmatpush.bf16.msra.mxu3 %v768_v42 }
  0x18   : > { %486 = vmatpush.bf16.msra.mxu1 %v763_v11 }
  0x1a   : > { %590 = vmatpush.bf16.msra.mxu3 %v767_v43 }
  0x23   : > { %720 = vmatmul.msk.bf16.gmra.mxu0 %vm404_vm0, %v383_v7 }
  0x90   : > { %v420_v12 = vpop.f32.mrf.mxu0 }
  0x91   : > { %v421_v14 = vadd.f32 %v779_v13, %v420_v12 }
  0x93   : > { %v430_v17 = vmax.f32 %v421_v14, 0.0 }
  0x98   : > { %v422_v15 = vpop.f32.mrf.mxu0 }
  0x99   : > { %v423_v16 = vadd.f32 %v779_v13, %v422_v15 }
  0x9b   : > { %v431_v18 = vmax.f32 %v423_v16, 0.0 }
  0x9d   : > { %v434_v19 = vpack.c.bf16 %v431_v18, %v430_v17 }
  0x9f   : > { %737 = vmatmul.msk.bf16.vlgmr.msra.gmra.mxu1 %vm472_vm1, %v434_v19 }
  0xa0   : > { %v425_v20 = vpop.f32.mrf.mxu0 }
  0xa1   : > { %v426_v21 = vadd.f32 %v779_v13, %v425_v20 }
  0xa3   : > { %v432_v24 = vmax.f32 %v426_v21, 0.0 }
  0xa8   : > { %v427_v22 = vpop.f32.mrf.mxu0 }
  0xa9   : > { %v428_v23 = vadd.f32 %v779_v13, %v427_v22 }
  0xab   : > { %v433_v25 = vmax.f32 %v428_v23, 0.0 }
  0xad   : > { %v435_v26 = vpack.c.bf16 %v433_v25, %v432_v24 }
  0xaf   : > { %738 = vmatmul.msk.bf16.gmra.mxu1 %vm472_vm1, %v435_v26 }
 0x11c   : > { %v488_v30 = vpop.f32.mrf.mxu1 }
 0x11d   : > { %v489_v31 = vadd.f32 %v780_v29, %v488_v30 }
 0x11f   : > { %602 = vst.msk [vmem:[%s369_s22] sm:$0xff] %vm505_vm3, %v489_v31 }
 0x124   : > { %v490_v32 = vpop.f32.mrf.mxu1 }
 0x125   : > { %v491_v33 = vadd.f32 %v780_v29, %v490_v32 }
 0x127   : > { %v498_v34 = vpack.c.bf16 %v491_v33, %v489_v31  ;;  %603 = vst.msk [vmem:[%s369_s22 + $0x8] sm:$0xff] %vm505_vm3, %v491_v33 }
 0x129   : > { %739 = vmatmul.msk.bf16.vlgmr.msra.gmra.mxu2 %vm505_vm3, %v498_v34 }
 0x12c   : > { %v493_v35 = vpop.f32.mrf.mxu1 }
 0x12d   : > { %v494_v36 = vadd.f32 %v780_v29, %v493_v35 }
 0x12f   : > { %604 = vst.msk [vmem:[%s369_s22 + $0x10] sm:$0xff] %vm505_vm3, %v494_v36 }
 0x134   : > { %v495_v37 = vpop.f32.mrf.mxu1 }
 0x135   : > { %v496_v38 = vadd.f32 %v780_v29, %v495_v37 }
 0x137   : > { %v499_v39 = vpack.c.bf16 %v496_v38, %v494_v36  ;;  %605 = vst.msk [vmem:[%s369_s22 + $0x18] sm:$0xff] %vm505_vm3, %v496_v38 }
 0x139   : > { %740 = vmatmul.msk.bf16.gmra.mxu2 %vm505_vm3, %v499_v39 }
 0x1ac   : > { %v525_v44 = vpop.f32.mrf.mxu2 }
 0x1ad   : > { %v526_v46 = vadd.f32 %v781_v45, %v525_v44 }
 0x1af   : > { %v535_v49 = vmax.f32 %v526_v46, 0.0 }
 0x1b4   : > { %v527_v47 = vpop.f32.mrf.mxu2 }
 0x1b5   : > { %v528_v48 = vadd.f32 %v781_v45, %v527_v47 }
 0x1b7   : > { %v536_v50 = vmax.f32 %v528_v48, 0.0 }
 0x1b9   : > { %v539_v51 = vpack.c.bf16 %v536_v50, %v535_v49 }
 0x1bb   : > { %757 = vmatmul.msk.bf16.vlgmr.msra.gmra.mxu3 %vm472_vm1, %v539_v51 }
 0x1bc   : > { %v530_v52 = vpop.f32.mrf.mxu2 }
 0x1bd   : > { %v531_v53 = vadd.f32 %v781_v45, %v530_v52 }
 0x1bf   : > { %v537_v56 = vmax.f32 %v531_v53, 0.0 }
 0x1c4   : > { %v532_v54 = vpop.f32.mrf.mxu2 }
 0x1c5   : > { %v533_v55 = vadd.f32 %v781_v45, %v532_v54 }
 0x1c7   : > { %v538_v57 = vmax.f32 %v533_v55, 0.0 }
 0x1c9   : > { %v540_v58 = vpack.c.bf16 %v538_v57, %v537_v56 }
 0x1cb   : > { %758 = vmatmul.msk.bf16.gmra.mxu3 %vm472_vm1, %v540_v58 }
 0x23e   : > { %v592_v60 = vpop.f32.mrf.mxu3 }
 0x23f   : > { %v593_v61 = vadd.f32 %v782_v59, %v592_v60 }
 0x241   : > { %606 = vst.msk [vmem:[%s375_s18] sm:$0xff] %vm404_vm0, %v593_v61 }
 0x246   : > { %v594_v62 = vpop.f32.mrf.mxu3 }
 0x247   : > { %v595_v63 = vadd.f32 %v782_v59, %v594_v62 }
 0x249   : > { %607 = vst.msk [vmem:[%s375_s18 + $0x8] sm:$0xff] %vm404_vm0, %v595_v63 }
 0x24e   : > { %v597_v0 = vpop.f32.mrf.mxu3 }
 0x24f   : > { %v598_v1 = vadd.f32 %v782_v59, %v597_v0 }
 0x251   : > { %608 = vst.msk [vmem:[%s375_s18 + $0x10] sm:$0xff] %vm404_vm0, %v598_v1 }
 0x256   : > { %v599_v2 = vpop.f32.mrf.mxu3 }
 0x257   : > { %v600_v3 = vadd.f32 %v782_v59, %v599_v2 }
 0x259   : > { %609 = vst.msk [vmem:[%s375_s18 + $0x18] sm:$0xff] %vm404_vm0, %v600_v3 }
 0x25a PF: > { %s21_s13 = sadd.s32 1, %s789_s13  }
 0x25b   : > { %p18_p4 = scmp.ge.s32.totalorder %s21_s13, 4  }
 0x25d   :  { %20 = sbr.rel (!%p18_p4) target bundleno = 1 (0x1), region = 98 }

</bundles_post_ra>
